<compile_context>
chip_gen: v6e
topology: v6e:2x2x1
jax: 0.10.0
libtpu: 0.0.40
codegen_flags: <defaults>
</compile_context>

<pallas_src>
import jax
import jax.numpy as jnp
from jax.experimental import pallas as pl
from jax.experimental.pallas import tpu as pltpu

BN_EPS = 0.001

_ROW_TILE_MAX = 128      # sublane-axis tile budget (rows of the (N*C, H*W) view)
_HW_TILE_MAX = 2048      # lane-axis tile budget (multiple of 128)
_VMEM_LIMIT = 32 * 1024 * 1024


def _pick_tile(dim, unit, max_tile):
    """Largest multiple of `unit` that divides `dim` and is <= max_tile.

    Falls back to the full dimension (always legal as a block dim) when `dim`
    is not a multiple of `unit`.
    """
    if dim % unit != 0:
        return dim
    t = min(dim, max(unit, (max_tile // unit) * unit))
    while dim % t:
        t -= unit
    return t


def bn_stats_kernel(x_ref, sum_ref, sq_ref):
    """Phase A: accumulate per-row sum(x) and sum(x*x) across H*W tiles.

    x_ref:   (row_tile, hw_tile)  input tile
    sum_ref: (row_tile, 1)        resident accumulator (same block across t)
    sq_ref:  (row_tile, 1)        resident accumulator (same block across t)
    """
    t = pl.program_id(1)

    @pl.when(t == 0)
    def _():
        sum_ref[...] = jnp.zeros_like(sum_ref)
        sq_ref[...] = jnp.zeros_like(sq_ref)

    x = x_ref[...].astype(jnp.float32)
    sum_ref[...] += jnp.sum(x, axis=-1, keepdims=True)
    sq_ref[...] += jnp.sum(x * x, axis=-1, keepdims=True)


def bn_act_kernel(x_ref, scale_ref, shift_ref, o_ref):
    """Phase B: fused normalize + affine + ReLU: max(x*scale + shift, 0).

    x_ref:     (row_tile, hw_tile)
    scale_ref: (row_tile, 1)   gamma * inv_std, per (n, c) row
    shift_ref: (row_tile, 1)   beta - mean * scale, per (n, c) row
    o_ref:     (row_tile, hw_tile)
    """
    x = x_ref[...].astype(jnp.float32)
    y = x * scale_ref[...] + shift_ref[...]
    o_ref[...] = jnp.maximum(y, 0.0).astype(o_ref.dtype)


def basic_layer_forward(x_nchw, gamma, beta):
    """BasicLayer forward: weight(identity) -> BatchNorm2d(batch stats) -> ReLU."""
    N, C, H, W = x_nchw.shape
    NC, HW = N * C, H * W

    # Free view of NCHW: rows = (n, c) pairs on sublanes, H*W on lanes.
    x2d = x_nchw.reshape(NC, HW)

    row_tile = _pick_tile(NC, 8, _ROW_TILE_MAX)
    hw_tile = _pick_tile(HW, 128, _HW_TILE_MAX)
    grid = (NC // row_tile, HW // hw_tile)

    # ---- Phase A: per-row partial sums / sums of squares -------------------
    sums, sqs = pl.pallas_call(
        bn_stats_kernel,
        out_shape=(
            jax.ShapeDtypeStruct((NC, 1), jnp.float32),
            jax.ShapeDtypeStruct((NC, 1), jnp.float32),
        ),
        grid=grid,
        in_specs=[pl.BlockSpec((row_tile, hw_tile), lambda r, t: (r, t))],
        out_specs=(
            pl.BlockSpec((row_tile, 1), lambda r, t: (r, 0)),
            pl.BlockSpec((row_tile, 1), lambda r, t: (r, 0)),
        ),
        compiler_params=pltpu.CompilerParams(
            dimension_semantics=("parallel", "arbitrary"),
            vmem_limit_bytes=_VMEM_LIMIT,
        ),
    )(x2d)

    # ---- Tiny per-channel math (C values) in plain JAX ---------------------
    count = jnp.float32(N * HW)
    ch_sum = jnp.sum(sums.reshape(N, C), axis=0)
    ch_sq = jnp.sum(sqs.reshape(N, C), axis=0)
    mean = ch_sum / count
    var = ch_sq / count - mean * mean          # one-pass biased variance
    inv_std = jax.lax.rsqrt(var + BN_EPS)
    scale_c = gamma.astype(jnp.float32) * inv_std
    shift_c = beta.astype(jnp.float32) - mean * scale_c
    # row r = n*C + c  ->  per-row params repeat the C-vector N times.
    scale = jnp.tile(scale_c, N).reshape(NC, 1)
    shift = jnp.tile(shift_c, N).reshape(NC, 1)

    # ---- Phase B: fused normalize + affine + ReLU ---------------------------
    out2d = pl.pallas_call(
        bn_act_kernel,
        out_shape=jax.ShapeDtypeStruct((NC, HW), x_nchw.dtype),
        grid=grid,
        in_specs=[
            pl.BlockSpec((row_tile, hw_tile), lambda r, t: (r, t)),
            pl.BlockSpec((row_tile, 1), lambda r, t: (r, 0)),
            pl.BlockSpec((row_tile, 1), lambda r, t: (r, 0)),
        ],
        out_specs=pl.BlockSpec((row_tile, hw_tile), lambda r, t: (r, t)),
        compiler_params=pltpu.CompilerParams(
            dimension_semantics=("parallel", "parallel"),
            vmem_limit_bytes=_VMEM_LIMIT,
        ),
    )(x2d, scale, shift)

    # Free view back to NCHW.
    return out2d.reshape(N, C, H, W)


def _reference(x_nchw, gamma, beta):
    """Pure-JAX reference: training-mode BatchNorm2d (eps=1e-3) + ReLU."""
    mean = jnp.mean(x_nchw, axis=(0, 2, 3), keepdims=True)
    var = jnp.mean((x_nchw - mean) ** 2, axis=(0, 2, 3), keepdims=True)
    y = (x_nchw - mean) * jax.lax.rsqrt(var + BN_EPS)
    y = y * gamma.reshape(1, -1, 1, 1) + beta.reshape(1, -1, 1, 1)
    return jnp.maximum(y, 0.0)


if __name__ == "__main__":
    key = jax.random.PRNGKey(0)

    N, C, H, W = 2, 4, 16, 16          # in_channels = out_channels = 4
    x = jax.random.normal(key, (N, C, H, W), dtype=jnp.float32)

    # BatchNorm2d default init: weight = 1, bias = 0 (deterministic).
    gamma = jnp.ones((C,), dtype=jnp.float32)
    beta = jnp.zeros((C,), dtype=jnp.float32)

    out = basic_layer_forward(x, gamma, beta)
    out = jax.block_until_ready(out)

    ref = _reference(x, gamma, beta)
    assert out.shape == (N, C, H, W)
    assert jnp.allclose(out, ref, atol=1e-5, rtol=1e-5)

    print("KERNEL_OK")
</pallas_src>

<mosaic_0001>
module attributes {stable_mosaic.version = 11 : i64} {
  func.func @bn_stats_kernel(%arg0: i32, %arg1: i32, %arg2: memref<8x256xf32, #tpu.memory_space<vmem>>, %arg3: memref<8x1xf32, #tpu.memory_space<vmem>>, %arg4: memref<8x1xf32, #tpu.memory_space<vmem>>) attributes {dimension_semantics = [#tpu.dimension_semantics<parallel>, #tpu.dimension_semantics<arbitrary>], iteration_bounds = array<i64: 1, 1>, scalar_prefetch = 0 : i64, scratch_operands = 0 : i64, tpu.core_type = #tpu.core_type<tc>, window_params = [{transform_indices = @transform_0, window_bounds = array<i64: 8, 256>}, {transform_indices = @transform_1, window_bounds = array<i64: 8, 1>}, {transform_indices = @transform_2, window_bounds = array<i64: 8, 1>}]} {
    %c0_i32 = arith.constant 0 : i32
    %0 = arith.cmpi eq, %arg1, %c0_i32 : i32
    %1 = arith.extui %0 : i1 to i32
    %c0_i32_0 = arith.constant 0 : i32
    %2 = arith.cmpi ne, %1, %c0_i32_0 : i32
    scf.if %2 {
      %cst_11 = arith.constant 0.000000e+00 : f32
      %15 = vector.broadcast %cst_11 : f32 to vector<8x1xf32>
      %c0_12 = arith.constant 0 : index
      %c0_13 = arith.constant 0 : index
      %16 = vector.load %arg3[%c0_12, %c0_13] : memref<8x1xf32, #tpu.memory_space<vmem>>, vector<8x1xf32>
      tpu.vector_store %arg3[%c0_12, %c0_13], %15 {strides = array<i32>} : memref<8x1xf32, #tpu.memory_space<vmem>>, vector<8x1xf32>,
      %cst_14 = arith.constant 0.000000e+00 : f32
      %17 = vector.broadcast %cst_14 : f32 to vector<8x1xf32>
      %c0_15 = arith.constant 0 : index
      %c0_16 = arith.constant 0 : index
      %18 = vector.load %arg4[%c0_15, %c0_16] : memref<8x1xf32, #tpu.memory_space<vmem>>, vector<8x1xf32>
      tpu.vector_store %arg4[%c0_15, %c0_16], %17 {strides = array<i32>} : memref<8x1xf32, #tpu.memory_space<vmem>>, vector<8x1xf32>,
    } else {
    }
    %c0 = arith.constant 0 : index
    %c0_1 = arith.constant 0 : index
    %3 = vector.load %arg2[%c0, %c0_1] : memref<8x256xf32, #tpu.memory_space<vmem>>, vector<8x256xf32>
    %c0_2 = arith.constant 0 : index
    %c0_3 = arith.constant 0 : index
    %4 = vector.load %arg3[%c0_2, %c0_3] : memref<8x1xf32, #tpu.memory_space<vmem>>, vector<8x1xf32>
    %cst = arith.constant dense<0.000000e+00> : vector<8xf32>
    %5 = vector.multi_reduction <add>, %3, %cst [1] : vector<8x256xf32> to vector<8xf32>
    %6 = vector.shape_cast %5 : vector<8xf32> to vector<8x1xf32>
    %7 = arith.addf %4, %6 : vector<8x1xf32>
    %c0_4 = arith.constant 0 : index
    %c0_5 = arith.constant 0 : index
    %8 = vector.load %arg3[%c0_4, %c0_5] : memref<8x1xf32, #tpu.memory_space<vmem>>, vector<8x1xf32>
    tpu.vector_store %arg3[%c0_4, %c0_5], %7 {strides = array<i32>} : memref<8x1xf32, #tpu.memory_space<vmem>>, vector<8x1xf32>,
    %c0_6 = arith.constant 0 : index
    %c0_7 = arith.constant 0 : index
    %9 = vector.load %arg4[%c0_6, %c0_7] : memref<8x1xf32, #tpu.memory_space<vmem>>, vector<8x1xf32>
    %10 = arith.mulf %3, %3 : vector<8x256xf32>
    %cst_8 = arith.constant dense<0.000000e+00> : vector<8xf32>
    %11 = vector.multi_reduction <add>, %10, %cst_8 [1] : vector<8x256xf32> to vector<8xf32>
    %12 = vector.shape_cast %11 : vector<8xf32> to vector<8x1xf32>
    %13 = arith.addf %9, %12 : vector<8x1xf32>
    %c0_9 = arith.constant 0 : index
    %c0_10 = arith.constant 0 : index
    %14 = vector.load %arg4[%c0_9, %c0_10] : memref<8x1xf32, #tpu.memory_space<vmem>>, vector<8x1xf32>
    tpu.vector_store %arg4[%c0_9, %c0_10], %13 {strides = array<i32>} : memref<8x1xf32, #tpu.memory_space<vmem>>, vector<8x1xf32>,
    return
  }
  func.func @transform_0(%arg0: i32, %arg1: i32) -> (i32, i32) {
    %c0_i32 = arith.constant 0 : i32
    return %arg0, %arg1 : i32, i32
  }
  func.func @transform_1(%arg0: i32, %arg1: i32) -> (i32, i32) {
    %c0_i32 = arith.constant 0 : i32
    %c0_i32_0 = arith.constant 0 : i32
    return %arg0, %c0_i32 : i32, i32
  }
  func.func @transform_2(%arg0: i32, %arg1: i32) -> (i32, i32) {
    %c0_i32 = arith.constant 0 : i32
    %c0_i32_0 = arith.constant 0 : i32
    return %arg0, %c0_i32 : i32, i32
  }
}

</mosaic_0001>

<bundles_post_ra>
// kernel: tpu_custom_call.1
= control target key start
LH: loop header
LB: loop body
LE: loop exit
PB: predicated region body
PF: predicated region fallthrough
CT: control target
= control target key end

     0   :  { %8 = vsyncpa [#allocation3], 0  ;;  %s79_s9 = smov [#allocation2]   ;;  %s121_s0 = inlined_call_operand.hbm [shape: f32[8,256], index: 0, kind: input, shape index: {}]   ;;  %s122_s1 = inlined_call_operand.vmem [shape: f32[8,1], index: 1, kind: output, shape index: {0}]   ;;  %s123_s2 = inlined_call_operand.vmem [shape: f32[8,1], index: 2, kind: output, shape index: {1}]  }
   0x1   :  { %s15_s10 = sshll.u32 %s79_s9, 4  ;;  %s16_s10 = int_to_ptr.vmem [resolvable:$true] %s15_s10 }
   0x2   :  { %s65_s11 = scalar_lea.vmem %s16_s10, 256  ;;  %p70_p1 = scmp.lt.s32.totalorder %s16_s10, %s16_s10 }
   0x3   :  { %p66_p0 = scmp.ne.s32.totalorder %s16_s10, %s65_s11  ;;  %p71_p2 = scmp.lt.s32.totalorder %s65_s11, %s65_s11 }
   0x5   :  { %p72_p3 = por %p71_p2, %p70_p1 }
   0x7   :  { %p73_p4 = pnand %p72_p3, %p66_p0 }
   0x9   :  { %76 = shalt.err (!%p73_p4)
}
   0xa   :  { %18 = dma.hbm_to_vmem [thread:$0]  %s121_s0, 256, %s16_s10, [#allocation3]  }
   0xb   :  { %77 = dma.done.wait [#allocation3], 256  }
   0xc   :  { %78 = vsyncadd [#allocation3], 4294967040  ;;  %vm26_vm0 = vcmask 7168   ;;  %v80_v0 = vmov 0.0   ;;  %v29_v1 = vld [vmem:[#allocation2] sm:$0xff]  ;;  %v30_v2 = vld [vmem:[#allocation2 + $0x8] sm:$0xff] }
   0xd   :  { %27 = vst.msk [vmem:[%s122_s1] sm:$0xff] %vm26_vm0, %v80_v0  ;;  %28 = vst.msk [vmem:[%s123_s2] sm:$0xff] %vm26_vm0, %v80_v0  ;;  %v32_v3 = vadd.f32 %v30_v2, %v29_v1  ;;  %v39_v4 = vmul.f32 %v29_v1, %v29_v1  ;;  %v40_v5 = vmul.f32 %v30_v2, %v30_v2 }
   0xf   :  { %33 = vadd.xlane.f32.xlu0 %v32_v3  ;;  %v41_v6 = vadd.f32 %v40_v5, %v39_v4 }
  0x13   :  { %42 = vadd.xlane.f32.xlu0 %v41_v6 }
  0x14   :  { %v31_v7 = vld [vmem:[%s122_s1] sm:$0xff] }
  0x15   :  { %v38_v10 = vld [vmem:[%s123_s2] sm:$0xff] }
  0x98   :  { %v34_v8 = vpop.xlane.xlu0 %33 }
  0x99   :  { %v35_v9 = vadd.f32 %v34_v8, %v31_v7 }
  0x9b   :  { %37 = vst.msk [vmem:[%s122_s1] sm:$0xff] %vm26_vm0, %v35_v9 }
  0x9c   :  { %v43_v11 = vpop.xlane.xlu0 %42 }
  0x9d   :  { %v44_v12 = vadd.f32 %v43_v11, %v38_v10 }
  0x9f   :  { %45 = vst.msk [vmem:[%s123_s2] sm:$0xff] %vm26_vm0, %v44_v12 }
  0xa0   :  { %54 = vsyncpa [#allocation3], 1 }

</bundles_post_ra>
